<compile_context>
chip_gen: v5e
topology: v5e:2x2
jax: 0.10.0
libtpu: 0.0.40
codegen_flags: <defaults>
</compile_context>

<pallas_src>
import math

import jax
import jax.numpy as jnp
from jax import lax
from jax.experimental import pallas as pl
from jax.experimental.pallas import tpu as pltpu

SIGMA_DATA = math.sqrt(1.0 / 3.0)


def _edm_denoise_kernel(sigma_ref,     # SMEM [B]        raw per-batch sigma
                        x_ref,         # VMEM [Bl, C, T] tokens on lanes (NCHW order kept)
                        w1c_ref,       # VMEM [C, Hid, 1] per-input-channel columns of W1
                        cb1_ref,       # VMEM [Hid, 1]   b1 + b_emb (folded)
                        wemb_ref,      # VMEM [Hid, 1]
                        w2_ref,        # VMEM [C, Hid]
                        b2_ref,        # VMEM [C, 1]
                        o_ref):        # VMEM [Bl, C, T]
    b_loc, C, T = x_ref.shape
    g = pl.program_id(0)
    sd2 = jnp.float32(SIGMA_DATA * SIGMA_DATA)
    sd = jnp.float32(SIGMA_DATA)

    # EDM preconditioning coefficients, computed in-kernel on tiny [1, T] rows
    # (vector EUP ops; avoids extra wrapper XLA launches and scalar-unit
    # transcendentals).  sigma > 0 assumed (EDM schedules) — log(0) would NaN.
    xs, xin_parts, cn_parts, skip_rows, outc_rows = [], [], [], [], []
    for lb in range(b_loc):
        sig = jnp.full((1, T), sigma_ref[g * b_loc + lb], dtype=jnp.float32)
        denom = sig * sig + sd2
        inv = lax.rsqrt(denom)                 # c_in  = 1/sqrt(sigma^2 + sd^2)
        skip_rows.append(sd2 * inv * inv)      # c_skip = sd^2 / (sigma^2 + sd^2)
        outc_rows.append(sig * sd * inv)       # c_out
        cn_parts.append(0.25 * jnp.log(sig))   # c_noise
        x_lb = x_ref[lb]                       # [C, T]
        xs.append(x_lb)
        xin_parts.append(inv * x_lb)           # c_in * x

    # Fuse the local batches along the lane axis -> one wide (b_loc*T)-lane slab.
    if b_loc > 1:
        x_in = jnp.concatenate(xin_parts, axis=1)       # [C, b_loc*T]
        c_noise = jnp.concatenate(cn_parts, axis=1)     # [1, b_loc*T]
    else:
        x_in, c_noise = xin_parts[0], cn_parts[0]

    # Layer 1: K = C = 4 contraction as 4 broadcast MACs on the VPU,
    # seeded with the folded noise-conditioned bias.
    h = wemb_ref[...] * c_noise + cb1_ref[...]          # [Hid, b_loc*T]
    for c in range(C):
        h = h + w1c_ref[c] * x_in[c:c + 1, :]

    # TODO(synk): PyTorch nn.GELU defaults to exact erf; tanh-approx gelu is used
    # here (same as the in-file reference) for guaranteed Mosaic lowering.
    a = jax.nn.gelu(h)

    # Layer 2 (K = Hid = 32) stays on the MXU.
    out = jnp.dot(w2_ref[...], a, preferred_element_type=jnp.float32)
    out = out + b2_ref[...]                             # [C, b_loc*T]

    # EDM skip/out recombination; lane-dense (multiple-of-128) unmasked stores.
    for lb in range(b_loc):
        o_ref[lb] = (skip_rows[lb] * xs[lb]
                     + outc_rows[lb] * out[:, lb * T:(lb + 1) * T])


def _num_batch_splits(batch):
    """2-way 'parallel' split only where there are 2 TensorCores per chip (v7x)."""
    try:
        kind = jax.devices()[0].device_kind.lower()
    except Exception:
        kind = ""
    if "v7" in kind and batch % 2 == 0:
        return 2
    return 1


@jax.jit
def edm_denoiser(x_nchw, sigma, params):
    """x_nchw: [B, C, H, W] float32; sigma: [B, 1, 1, 1] float32 (> 0)."""
    B, C, H, W = x_nchw.shape
    T = H * W
    Hid = params["w1"].shape[1]

    # NCHW -> [B, C, T] and the parameter re-shapes below are free (no transposes).
    x_tok = x_nchw.reshape(B, C, T)
    sig_vec = sigma.reshape(B).astype(jnp.float32)        # raw sigmas -> 1-D SMEM

    # Parameter prep (shape-only + one tiny add; hoistable outside a sampling loop).
    w1_cols = params["w1"].reshape(C, Hid, 1)             # per-channel columns of W1
    cb1 = (params["b1"] + params["b_emb"]).reshape(Hid, 1)
    w_emb = params["w_emb"].reshape(Hid, 1)
    b2 = params["b2"].reshape(C, 1)

    splits = _num_batch_splits(B)
    b_loc = B // splits

    cost = pl.CostEstimate(
        flops=4 * B * T * C * Hid,                        # two matmul-equivalents
        transcendentals=B * T * Hid + 8 * B * T,          # gelu + coeff rows
        bytes_accessed=(2 * B * C * T + 2 * C * Hid + 3 * Hid + C + B) * 4,
    )

    out_tok = pl.pallas_call(
        _edm_denoise_kernel,
        out_shape=jax.ShapeDtypeStruct((B, C, T), jnp.float32),
        grid=(splits,),
        in_specs=[
            pl.BlockSpec(memory_space=pltpu.MemorySpace.SMEM),     # sigma [B]
            pl.BlockSpec((b_loc, C, T), lambda g: (g, 0, 0)),      # x (lane-dense)
            pl.BlockSpec((C, Hid, 1), lambda g: (0, 0, 0)),        # W1 columns
            pl.BlockSpec((Hid, 1), lambda g: (0, 0)),              # b1 + b_emb
            pl.BlockSpec((Hid, 1), lambda g: (0, 0)),              # w_emb
            pl.BlockSpec((C, Hid), lambda g: (0, 0)),              # W2
            pl.BlockSpec((C, 1), lambda g: (0, 0)),                # b2
        ],
        out_specs=pl.BlockSpec((b_loc, C, T), lambda g: (g, 0, 0)),
        compiler_params=pltpu.CompilerParams(
            dimension_semantics=("parallel",)),
        cost_estimate=cost,
    )(sig_vec, x_tok, w1_cols, cb1, w_emb, params["w2"], b2)

    # [B, C, T] -> NCHW is again a free reshape.
    return out_tok.reshape(B, C, H, W)


def _reference(x_nchw, sigma, params):
    """Pure-JAX reference of the same computation (for validation)."""
    sd2 = SIGMA_DATA * SIGMA_DATA
    c_skip = sd2 / (sigma ** 2 + sd2)
    c_out = sigma * SIGMA_DATA / jnp.sqrt(sd2 + sigma ** 2)
    c_in = 1.0 / jnp.sqrt(sd2 + sigma ** 2)
    c_noise = (0.25 * jnp.log(sigma)).reshape(-1)                 # [B]

    B, C, H, W = x_nchw.shape
    x_tok = (c_in * x_nchw).reshape(B, C, H * W)                  # [B, C, T]
    emb = c_noise[:, None] * params["w_emb"] + params["b_emb"]    # [B, Hid]
    h = jnp.einsum("ch,bct->bht", params["w1"], x_tok) \
        + params["b1"][None, :, None] + emb[:, :, None]
    out = jnp.einsum("ch,bht->bct", params["w2"], jax.nn.gelu(h)) \
        + params["b2"][None, :, None]
    out_nchw = out.reshape(B, C, H, W)
    return c_skip * x_nchw + c_out * out_nchw


if __name__ == "__main__":
    key = jax.random.PRNGKey(0)
    B, C, H, W = 2, 4, 16, 16
    HID = 32

    k_x, k_s, k_w1, k_b1, k_we, k_be, k_w2, k_b2 = jax.random.split(key, 8)

    x = jax.random.normal(k_x, (B, C, H, W), dtype=jnp.float32)
    sigma = jnp.exp(jax.random.normal(k_s, (B, 1, 1, 1),
                                      dtype=jnp.float32) * 0.5)

    params = {
        # W1 stored input-major [C, Hid] so its per-channel columns are a free reshape.
        "w1":    jax.random.normal(k_w1, (C, HID), jnp.float32) / math.sqrt(C),
        "b1":    jax.random.normal(k_b1, (HID,), jnp.float32) * 0.02,
        "w_emb": jax.random.normal(k_we, (HID,), jnp.float32) * 0.1,
        "b_emb": jax.random.normal(k_be, (HID,), jnp.float32) * 0.02,
        "w2":    jax.random.normal(k_w2, (C, HID), jnp.float32) / math.sqrt(HID),
        "b2":    jax.random.normal(k_b2, (C,), jnp.float32) * 0.02,
    }

    out = edm_denoiser(x, sigma, params)
    jax.block_until_ready(out)

    ref = _reference(x, sigma, params)
    assert out.shape == (B, C, H, W)
    assert jnp.allclose(out, ref, atol=1e-3, rtol=1e-3), "mismatch vs reference"

    print("KERNEL_OK")
</pallas_src>

<mosaic_0001>
module attributes {stable_mosaic.version = 11 : i64} {
  func.func @_edm_denoise_kernel(%arg0: i32, %arg1: memref<2xf32, #tpu.memory_space<smem>>, %arg2: memref<2x4x256xf32, #tpu.memory_space<vmem>>, %arg3: memref<4x32x1xf32, #tpu.memory_space<vmem>>, %arg4: memref<32x1xf32, #tpu.memory_space<vmem>>, %arg5: memref<32x1xf32, #tpu.memory_space<vmem>>, %arg6: memref<4x32xf32, #tpu.memory_space<vmem>>, %arg7: memref<4x1xf32, #tpu.memory_space<vmem>>, %arg8: memref<2x4x256xf32, #tpu.memory_space<vmem>>) attributes {dimension_semantics = [#tpu.dimension_semantics<parallel>], iteration_bounds = array<i64: 1>, scalar_prefetch = 0 : i64, scratch_operands = 0 : i64, tpu.core_type = #tpu.core_type<tc>, window_params = [{transform_indices = @transform_0, window_bounds = array<i64: 2>}, {transform_indices = @transform_1, window_bounds = array<i64: 2, 4, 256>}, {pipeline_mode = #tpu.pipeline_mode<synchronous>, transform_indices = @transform_2, window_bounds = array<i64: 4, 32, 1>}, {pipeline_mode = #tpu.pipeline_mode<synchronous>, transform_indices = @transform_3, window_bounds = array<i64: 32, 1>}, {pipeline_mode = #tpu.pipeline_mode<synchronous>, transform_indices = @transform_4, window_bounds = array<i64: 32, 1>}, {pipeline_mode = #tpu.pipeline_mode<synchronous>, transform_indices = @transform_5, window_bounds = array<i64: 4, 32>}, {pipeline_mode = #tpu.pipeline_mode<synchronous>, transform_indices = @transform_6, window_bounds = array<i64: 4, 1>}, {transform_indices = @transform_7, window_bounds = array<i64: 2, 4, 256>}]} {
    %c2_i32 = arith.constant 2 : i32
    %0 = arith.muli %arg0, %c2_i32 : i32
    %c0_i32 = arith.constant 0 : i32
    %1 = arith.addi %0, %c0_i32 : i32
    %2 = arith.index_cast %1 : i32 to index
    %3 = memref.load %arg1[%2] : memref<2xf32, #tpu.memory_space<smem>>
    %4 = vector.broadcast %3 : f32 to vector<1x256xf32>
    %5 = arith.mulf %4, %4 : vector<1x256xf32>
    %cst = arith.constant 0.333333343 : f32
    %6 = vector.broadcast %cst : f32 to vector<1x256xf32>
    %7 = arith.addf %5, %6 : vector<1x256xf32>
    %8 = math.rsqrt %7 : vector<1x256xf32>
    %cst_0 = arith.constant 0.333333343 : f32
    %9 = vector.broadcast %cst_0 : f32 to vector<1x256xf32>
    %10 = arith.mulf %9, %8 : vector<1x256xf32>
    %11 = arith.mulf %10, %8 : vector<1x256xf32>
    %cst_1 = arith.constant 0.577350259 : f32
    %12 = vector.broadcast %cst_1 : f32 to vector<1x256xf32>
    %13 = arith.mulf %4, %12 : vector<1x256xf32>
    %14 = arith.mulf %13, %8 : vector<1x256xf32>
    %15 = math.log %4 : vector<1x256xf32>
    %cst_2 = arith.constant 2.500000e-01 : f32
    %16 = vector.broadcast %cst_2 : f32 to vector<1x256xf32>
    %17 = arith.mulf %16, %15 : vector<1x256xf32>
    %c0 = arith.constant 0 : index
    %c0_3 = arith.constant 0 : index
    %c0_4 = arith.constant 0 : index
    %18 = vector.load %arg2[%c0, %c0_3, %c0_4] : memref<2x4x256xf32, #tpu.memory_space<vmem>>, vector<1x4x256xf32>
    %19 = vector.shape_cast %18 : vector<1x4x256xf32> to vector<4x256xf32>
    %20 = vector.broadcast %8 : vector<1x256xf32> to vector<4x256xf32>
    %21 = arith.mulf %20, %19 : vector<4x256xf32>
    %c2_i32_5 = arith.constant 2 : i32
    %22 = arith.muli %arg0, %c2_i32_5 : i32
    %c1_i32 = arith.constant 1 : i32
    %23 = arith.addi %22, %c1_i32 : i32
    %24 = arith.index_cast %23 : i32 to index
    %25 = memref.load %arg1[%24] : memref<2xf32, #tpu.memory_space<smem>>
    %26 = vector.broadcast %25 : f32 to vector<1x256xf32>
    %27 = arith.mulf %26, %26 : vector<1x256xf32>
    %cst_6 = arith.constant 0.333333343 : f32
    %28 = vector.broadcast %cst_6 : f32 to vector<1x256xf32>
    %29 = arith.addf %27, %28 : vector<1x256xf32>
    %30 = math.rsqrt %29 : vector<1x256xf32>
    %cst_7 = arith.constant 0.333333343 : f32
    %31 = vector.broadcast %cst_7 : f32 to vector<1x256xf32>
    %32 = arith.mulf %31, %30 : vector<1x256xf32>
    %33 = arith.mulf %32, %30 : vector<1x256xf32>
    %cst_8 = arith.constant 0.577350259 : f32
    %34 = vector.broadcast %cst_8 : f32 to vector<1x256xf32>
    %35 = arith.mulf %26, %34 : vector<1x256xf32>
    %36 = arith.mulf %35, %30 : vector<1x256xf32>
    %37 = math.log %26 : vector<1x256xf32>
    %cst_9 = arith.constant 2.500000e-01 : f32
    %38 = vector.broadcast %cst_9 : f32 to vector<1x256xf32>
    %39 = arith.mulf %38, %37 : vector<1x256xf32>
    %c1 = arith.constant 1 : index
    %c0_10 = arith.constant 0 : index
    %c0_11 = arith.constant 0 : index
    %40 = vector.load %arg2[%c1, %c0_10, %c0_11] : memref<2x4x256xf32, #tpu.memory_space<vmem>>, vector<1x4x256xf32>
    %41 = vector.shape_cast %40 : vector<1x4x256xf32> to vector<4x256xf32>
    %42 = vector.broadcast %30 : vector<1x256xf32> to vector<4x256xf32>
    %43 = arith.mulf %42, %41 : vector<4x256xf32>
    %44 = tpu.concatenate %21, %43 in 1 : vector<4x256xf32>, vector<4x256xf32> -> vector<4x512xf32>
    %45 = tpu.concatenate %17, %39 in 1 : vector<1x256xf32>, vector<1x256xf32> -> vector<1x512xf32>
    %c0_12 = arith.constant 0 : index
    %c0_13 = arith.constant 0 : index
    %46 = vector.load %arg5[%c0_12, %c0_13] : memref<32x1xf32, #tpu.memory_space<vmem>>, vector<32x1xf32>
    %47 = vector.broadcast %46 : vector<32x1xf32> to vector<32x512xf32>
    %48 = vector.broadcast %45 : vector<1x512xf32> to vector<32x512xf32>
    %49 = arith.mulf %47, %48 : vector<32x512xf32>
    %c0_14 = arith.constant 0 : index
    %c0_15 = arith.constant 0 : index
    %50 = vector.load %arg4[%c0_14, %c0_15] : memref<32x1xf32, #tpu.memory_space<vmem>>, vector<32x1xf32>
    %51 = vector.broadcast %50 : vector<32x1xf32> to vector<32x512xf32>
    %52 = arith.addf %49, %51 : vector<32x512xf32>
    %c0_16 = arith.constant 0 : index
    %c0_17 = arith.constant 0 : index
    %c0_18 = arith.constant 0 : index
    %53 = vector.load %arg3[%c0_16, %c0_17, %c0_18] : memref<4x32x1xf32, #tpu.memory_space<vmem>>, vector<1x32x1xf32>
    %54 = vector.shape_cast %53 : vector<1x32x1xf32> to vector<32x1xf32>
    %55 = vector.extract_strided_slice %44 {offsets = [0, 0], sizes = [1, 512], strides = [1, 1]} : vector<4x512xf32> to vector<1x512xf32>
    %56 = vector.broadcast %54 : vector<32x1xf32> to vector<32x512xf32>
    %57 = vector.broadcast %55 : vector<1x512xf32> to vector<32x512xf32>
    %58 = arith.mulf %56, %57 : vector<32x512xf32>
    %59 = arith.addf %52, %58 : vector<32x512xf32>
    %c1_19 = arith.constant 1 : index
    %c0_20 = arith.constant 0 : index
    %c0_21 = arith.constant 0 : index
    %60 = vector.load %arg3[%c1_19, %c0_20, %c0_21] : memref<4x32x1xf32, #tpu.memory_space<vmem>>, vector<1x32x1xf32>
    %61 = vector.shape_cast %60 : vector<1x32x1xf32> to vector<32x1xf32>
    %62 = vector.extract_strided_slice %44 {offsets = [1, 0], sizes = [1, 512], strides = [1, 1]} : vector<4x512xf32> to vector<1x512xf32>
    %63 = vector.broadcast %61 : vector<32x1xf32> to vector<32x512xf32>
    %64 = vector.broadcast %62 : vector<1x512xf32> to vector<32x512xf32>
    %65 = arith.mulf %63, %64 : vector<32x512xf32>
    %66 = arith.addf %59, %65 : vector<32x512xf32>
    %c2 = arith.constant 2 : index
    %c0_22 = arith.constant 0 : index
    %c0_23 = arith.constant 0 : index
    %67 = vector.load %arg3[%c2, %c0_22, %c0_23] : memref<4x32x1xf32, #tpu.memory_space<vmem>>, vector<1x32x1xf32>
    %68 = vector.shape_cast %67 : vector<1x32x1xf32> to vector<32x1xf32>
    %69 = vector.extract_strided_slice %44 {offsets = [2, 0], sizes = [1, 512], strides = [1, 1]} : vector<4x512xf32> to vector<1x512xf32>
    %70 = vector.broadcast %68 : vector<32x1xf32> to vector<32x512xf32>
    %71 = vector.broadcast %69 : vector<1x512xf32> to vector<32x512xf32>
    %72 = arith.mulf %70, %71 : vector<32x512xf32>
    %73 = arith.addf %66, %72 : vector<32x512xf32>
    %c3 = arith.constant 3 : index
    %c0_24 = arith.constant 0 : index
    %c0_25 = arith.constant 0 : index
    %74 = vector.load %arg3[%c3, %c0_24, %c0_25] : memref<4x32x1xf32, #tpu.memory_space<vmem>>, vector<1x32x1xf32>
    %75 = vector.shape_cast %74 : vector<1x32x1xf32> to vector<32x1xf32>
    %76 = vector.extract_strided_slice %44 {offsets = [3, 0], sizes = [1, 512], strides = [1, 1]} : vector<4x512xf32> to vector<1x512xf32>
    %77 = vector.broadcast %75 : vector<32x1xf32> to vector<32x512xf32>
    %78 = vector.broadcast %76 : vector<1x512xf32> to vector<32x512xf32>
    %79 = arith.mulf %77, %78 : vector<32x512xf32>
    %80 = arith.addf %73, %79 : vector<32x512xf32>
    %81 = arith.mulf %80, %80 : vector<32x512xf32>
    %82 = arith.mulf %80, %81 : vector<32x512xf32>
    %cst_26 = arith.constant 4.471500e-02 : f32
    %83 = vector.broadcast %cst_26 : f32 to vector<32x512xf32>
    %84 = arith.mulf %83, %82 : vector<32x512xf32>
    %85 = arith.addf %80, %84 : vector<32x512xf32>
    %cst_27 = arith.constant 0.797884583 : f32
    %86 = vector.broadcast %cst_27 : f32 to vector<32x512xf32>
    %87 = arith.mulf %86, %85 : vector<32x512xf32>
    %88 = math.tanh %87 : vector<32x512xf32>
    %cst_28 = arith.constant 1.000000e+00 : f32
    %89 = vector.broadcast %cst_28 : f32 to vector<32x512xf32>
    %90 = arith.addf %89, %88 : vector<32x512xf32>
    %cst_29 = arith.constant 5.000000e-01 : f32
    %91 = vector.broadcast %cst_29 : f32 to vector<32x512xf32>
    %92 = arith.mulf %91, %90 : vector<32x512xf32>
    %93 = arith.mulf %80, %92 : vector<32x512xf32>
    %c0_30 = arith.constant 0 : index
    %c0_31 = arith.constant 0 : index
    %94 = vector.load %arg6[%c0_30, %c0_31] : memref<4x32xf32, #tpu.memory_space<vmem>>, vector<4x32xf32>
    %cst_32 = arith.constant dense<0.000000e+00> : vector<4x512xf32>
    %95 = tpu.matmul %94, %93, %cst_32 {dimension_numbers = #tpu.dot_dimension_numbers<[1], [0], [0], [1], [0, 0, 1, 1], [], []>} : vector<4x32xf32>, vector<32x512xf32>, vector<4x512xf32> -> vector<4x512xf32>
    %c0_33 = arith.constant 0 : index
    %c0_34 = arith.constant 0 : index
    %96 = vector.load %arg7[%c0_33, %c0_34] : memref<4x1xf32, #tpu.memory_space<vmem>>, vector<4x1xf32>
    %97 = vector.broadcast %96 : vector<4x1xf32> to vector<4x512xf32>
    %98 = arith.addf %95, %97 : vector<4x512xf32>
    %99 = vector.broadcast %11 : vector<1x256xf32> to vector<4x256xf32>
    %100 = arith.mulf %99, %19 : vector<4x256xf32>
    %101 = vector.extract_strided_slice %98 {offsets = [0, 0], sizes = [4, 256], strides = [1, 1]} : vector<4x512xf32> to vector<4x256xf32>
    %102 = vector.broadcast %14 : vector<1x256xf32> to vector<4x256xf32>
    %103 = arith.mulf %102, %101 : vector<4x256xf32>
    %104 = arith.addf %100, %103 : vector<4x256xf32>
    %c0_35 = arith.constant 0 : index
    %c0_36 = arith.constant 0 : index
    %c0_37 = arith.constant 0 : index
    %105 = vector.load %arg8[%c0_35, %c0_36, %c0_37] : memref<2x4x256xf32, #tpu.memory_space<vmem>>, vector<1x4x256xf32>
    %106 = vector.shape_cast %105 : vector<1x4x256xf32> to vector<4x256xf32>
    %107 = vector.shape_cast %104 : vector<4x256xf32> to vector<1x4x256xf32>
    tpu.vector_store %arg8[%c0_35, %c0_36, %c0_37], %107 {strides = array<i32>} : memref<2x4x256xf32, #tpu.memory_space<vmem>>, vector<1x4x256xf32>,
    %108 = vector.broadcast %33 : vector<1x256xf32> to vector<4x256xf32>
    %109 = arith.mulf %108, %41 : vector<4x256xf32>
    %110 = vector.extract_strided_slice %98 {offsets = [0, 256], sizes = [4, 256], strides = [1, 1]} : vector<4x512xf32> to vector<4x256xf32>
    %111 = vector.broadcast %36 : vector<1x256xf32> to vector<4x256xf32>
    %112 = arith.mulf %111, %110 : vector<4x256xf32>
    %113 = arith.addf %109, %112 : vector<4x256xf32>
    %c1_38 = arith.constant 1 : index
    %c0_39 = arith.constant 0 : index
    %c0_40 = arith.constant 0 : index
    %114 = vector.load %arg8[%c1_38, %c0_39, %c0_40] : memref<2x4x256xf32, #tpu.memory_space<vmem>>, vector<1x4x256xf32>
    %115 = vector.shape_cast %114 : vector<1x4x256xf32> to vector<4x256xf32>
    %116 = vector.shape_cast %113 : vector<4x256xf32> to vector<1x4x256xf32>
    tpu.vector_store %arg8[%c1_38, %c0_39, %c0_40], %116 {strides = array<i32>} : memref<2x4x256xf32, #tpu.memory_space<vmem>>, vector<1x4x256xf32>,
    return
  }
  func.func @transform_0(%arg0: i32) -> i32 {
    %c0_i32 = arith.constant 0 : i32
    %c0_i32_0 = arith.constant 0 : i32
    return %c0_i32 : i32
  }
  func.func @transform_1(%arg0: i32) -> (i32, i32, i32) {
    %c0_i32 = arith.constant 0 : i32
    %c0_i32_0 = arith.constant 0 : i32
    %c0_i32_1 = arith.constant 0 : i32
    return %arg0, %c0_i32, %c0_i32_0 : i32, i32, i32
  }
  func.func @transform_2(%arg0: i32) -> (i32, i32, i32) {
    %c0_i32 = arith.constant 0 : i32
    %c0_i32_0 = arith.constant 0 : i32
    %c0_i32_1 = arith.constant 0 : i32
    %c0_i32_2 = arith.constant 0 : i32
    return %c0_i32, %c0_i32_0, %c0_i32_1 : i32, i32, i32
  }
  func.func @transform_3(%arg0: i32) -> (i32, i32) {
    %c0_i32 = arith.constant 0 : i32
    %c0_i32_0 = arith.constant 0 : i32
    %c0_i32_1 = arith.constant 0 : i32
    return %c0_i32, %c0_i32_0 : i32, i32
  }
  func.func @transform_4(%arg0: i32) -> (i32, i32) {
    %c0_i32 = arith.constant 0 : i32
    %c0_i32_0 = arith.constant 0 : i32
    %c0_i32_1 = arith.constant 0 : i32
    return %c0_i32, %c0_i32_0 : i32, i32
  }
  func.func @transform_5(%arg0: i32) -> (i32, i32) {
    %c0_i32 = arith.constant 0 : i32
    %c0_i32_0 = arith.constant 0 : i32
    %c0_i32_1 = arith.constant 0 : i32
    return %c0_i32, %c0_i32_0 : i32, i32
  }
  func.func @transform_6(%arg0: i32) -> (i32, i32) {
    %c0_i32 = arith.constant 0 : i32
    %c0_i32_0 = arith.constant 0 : i32
    %c0_i32_1 = arith.constant 0 : i32
    return %c0_i32, %c0_i32_0 : i32, i32
  }
  func.func @transform_7(%arg0: i32) -> (i32, i32, i32) {
    %c0_i32 = arith.constant 0 : i32
    %c0_i32_0 = arith.constant 0 : i32
    %c0_i32_1 = arith.constant 0 : i32
    return %arg0, %c0_i32, %c0_i32_0 : i32, i32, i32
  }
}

</mosaic_0001>

<bundles_post_ra>
// kernel: edm_denoiser.1
= control target key start
LH: loop header
LB: loop body
LE: loop exit
PB: predicated region body
PF: predicated region fallthrough
CT: control target
= control target key end

     0   :  { %12 = vsyncpa [#allocation3], 0  ;;  %s749_s27 = smov [#allocation2]   ;;  %s1176_s0 = inlined_call_operand.vmem [shape: f32[2], index: 0, kind: input, shape index: {}]   ;;  %s1177_s1 = inlined_call_operand.vmem [shape: f32[2,4,256], index: 1, kind: input, shape index: {}]   ;;  %s1178_s2 = inlined_call_operand.vmem [shape: f32[4,32,1], index: 2, kind: input, shape index: {}]   ;;  %s1179_s3 = inlined_call_operand.vmem [shape: f32[32,1], index: 3, kind: input, shape index: {}]   ;;  %s1180_s4 = inlined_call_operand.vmem [shape: f32[32,1], index: 4, kind: input, shape index: {}]   ;;  %s1181_s5 = inlined_call_operand.vmem [shape: f32[4,32], index: 5, kind: input, shape index: {}]   ;;  %s1182_s6 = inlined_call_operand.vmem [shape: f32[4,1], index: 6, kind: input, shape index: {}]   ;;  %s1183_s7 = inlined_call_operand.vmem [shape: f32[2,4,256], index: 7, kind: output, shape index: {}]  }
   0x1   :  { %s18_s26 = sshll.u32 %s1176_s0, 4  ;;  %s19_s26 = int_to_ptr.vmem [resolvable:$true] %s18_s26 }
   0x2   :  { %21 = dma.vmem_to_smem %s19_s26, 16, %s749_s27, [#allocation3]  }
   0x3   :  { %747 = dma.done.wait [#allocation3], 16  }
   0x4   :  { %748 = vsyncadd [#allocation3], 4294967280 }
   0x5   :  { %38 = sfence }
   0x6   :  { %v137_v0 = vld [vmem:[%s1179_s3 + $0x18] sm:$0xff]  ;;  %v101_v2 = vld [vmem:[%s1180_s4 + $0x8] sm:$0xff]  ;;  %v750_v3 = vmov 0   ;;  %v102_v5 = vld [vmem:[%s1180_s4 + $0x10] sm:$0xff]  ;;  %s40_s10 = sld [smem:[#allocation2]]  ;;  %vm560_vm6 = vcmask 261120  }
   0x7   :  { %v103_v1 = vld [vmem:[%s1180_s4 + $0x18] sm:$0xff]  ;;  %694 = vset.pattern.permute.xlu2 %v750_v3  ;;  %693 = vset.pattern.permute.xlu1 %v750_v3  ;;  %v136_v6 = vld [vmem:[%s1179_s3 + $0x10] sm:$0xff]  ;;  %v100_v9 = vld [vmem:[%s1180_s4] sm:$0xff]  ;;  %s671_s15 = sld [smem:[#allocation2 + $0x1]]  ;;  %vm650_vm7 = vcmask 1043456  }
   0x8   :  { %692 = vset.pattern.permute.xlu0 %v750_v3  ;;  %155 = vperm.xlu1 %693, %v137_v0   ;;  %v169_v4 = vld [vmem:[%s1178_s2 + $0x18] sm:$0xff]  ;;  %v168_v8 = vld [vmem:[%s1178_s2 + $0x10] sm:$0xff]  ;;  %v167_v10 = vld [vmem:[%s1178_s2 + $0x8] sm:$0xff] }
   0x9   :  { %121 = vperm.xlu0 %692, %v103_v1   ;;  %111 = vperm.xlu2 %694, %v101_v2   ;;  %v676_v7 = vld [vmem:[%s1178_s2 + $0x38] sm:$0xff]  ;;  %v135_v11 = vld [vmem:[%s1179_s3 + $0x8] sm:$0xff]  ;;  %v675_v12 = vld [vmem:[%s1178_s2 + $0x30] sm:$0xff] }
   0xa   :  { %v134_v13 = vld [vmem:[%s1179_s3] sm:$0xff]  ;;  %v680_v14 = vld [vmem:[%s1178_s2 + $0x58] sm:$0xff]  ;;  %v679_v16 = vld [vmem:[%s1178_s2 + $0x50] sm:$0xff] }
   0xb   :  { %v166_v15 = vld [vmem:[%s1178_s2] sm:$0xff]  ;;  %v674_v17 = vld [vmem:[%s1178_s2 + $0x28] sm:$0xff]  ;;  %v684_v18 = vld [vmem:[%s1178_s2 + $0x78] sm:$0xff] }
   0xc   :  { %v848_v19 = vstv %s40_s10  ;;  %v678_v21 = vld [vmem:[%s1178_s2 + $0x48] sm:$0xff]  ;;  %v673_v22 = vld [vmem:[%s1178_s2 + $0x20] sm:$0xff]  ;;  %v683_v23 = vld [vmem:[%s1178_s2 + $0x70] sm:$0xff] }
   0xd   :  { %v42_v20 = vmul.f32 %v848_v19, %v848_v19  ;;  %v861_v25 = vstv %s671_s15  ;;  %v682_v27 = vld [vmem:[%s1178_s2 + $0x68] sm:$0xff]  ;;  %v677_v29 = vld [vmem:[%s1178_s2 + $0x40] sm:$0xff] }
   0xe   :  { %v66_v26 = vmul.f32 %v861_v25, %v861_v25  ;;  %v681_v30 = vld [vmem:[%s1178_s2 + $0x60] sm:$0xff]  ;;  %v889_v47 = vld [vmem:[%s1177_s1 + $0x8] sm:$0xff] }
   0xf   :  { %v43_v24 = vadd.f32 0.33333334, %v42_v20  ;;  %v554_v37 = vld [vmem:[%s1182_s6] sm:$0xf]  ;;  %1189 = vst [vmem:[#allocation6_spill] sm:$0xff] %v889_v47 }
  0x10   :  { %187 = vperm.xlu1 %693, %v169_v4   ;;  %v67_v31 = vadd.f32 0.33333334, %v66_v26  ;;  %v880_v41 = vld [vmem:[%s1177_s1] sm:$0xff] }
  0x11   :  { %116 = vperm.xlu0 %692, %v102_v5   ;;  %150 = vperm.xlu2 %694, %v136_v6   ;;  %695 = vrsqrt.f32 %v43_v24  ;;  %vm50_vm0 = vweird.f32 %v43_v24  ;;  %1188 = vst [vmem:[#allocation5_spill] sm:$0xff] %v880_v41 }
  0x12   :  { %697 = vrsqrt.f32 %v67_v31  ;;  %vm74_vm3 = vweird.f32 %v67_v31 }
  0x13   :  { %699 = vlog2.f32 %v848_v19 }
  0x14   :  { %701 = vlog2.f32 %v861_v25 }
  0x17   :  { %v696_v28 = vpop.eup %695 }
  0x18   :  { %248 = vperm.xlu1 %693, %v676_v7   ;;  %v45_v32 = vmul.f32 %v696_v28, %v43_v24  ;;  %v698_v36 = vpop.eup %697  ;;  %vm51_vm1 = vweird.f32 %v696_v28 }
  0x19   :  { %182 = vperm.xlu0 %692, %v168_v8   ;;  %106 = vperm.xlu2 %694, %v100_v9   ;;  %v69_v38 = vmul.f32 %v698_v36, %v67_v31  ;;  %vm52_vm2 = vmor %vm50_vm0, %vm51_vm1  ;;  %vm75_vm4 = vweird.f32 %v698_v36  ;;  %v700_v55 = vpop.eup %699 }
  0x1a   :  { %v46_v33 = vmul.f32 %v696_v28, %v45_v32  ;;  %vm76_vm5 = vmor %vm74_vm3, %vm75_vm4  ;;  %v702_v59 = vpop.eup %701  ;;  %v59_v60 = vmul.f32 0.6931472, %v700_v55 }
  0x1b   :  { %v70_v40 = vmul.f32 %v698_v36, %v69_v38  ;;  %v83_v61 = vmul.f32 0.6931472, %v702_v59 }
  0x1c   :  { %v47_v34 = vmul.f32 0.5, %v46_v33  ;;  %v60_v62 = vmul.f32 0.25, %v59_v60 }
  0x1d   :  { %v71_v43 = vmul.f32 0.5, %v70_v40  ;;  %v84_v0 = vmul.f32 0.25, %v83_v61 }
  0x1e   :  { %v48_v35 = vsub.f32 1.5, %v47_v34  ;;  %v124_v3 = vperm.slane %v60_v62, 0 }
  0x1f   :  { %v72_v45 = vsub.f32 1.5, %v71_v43  ;;  %v125_v6 = vperm.slane %v84_v0, 0 }
  0x20   :  { %177 = vperm.xlu1 %693, %v167_v10   ;;  %v49_v39 = vmul.f32 %v696_v28, %v48_v35 }
  0x21   :  { %145 = vperm.xlu0 %692, %v135_v11   ;;  %243 = vperm.xlu2 %694, %v675_v12   ;;  %v73_v46 = vmul.f32 %v698_v36, %v72_v45 }
  0x22   :  { %v882_v42 = vsel %vm52_vm2, %v696_v28, %v49_v39 }
  0x23   :  { %v62_v44 = vmul.f32 %v880_v41, %v882_v42  ;;  %v891_v48 = vsel %vm76_vm5, %v698_v36, %v73_v46 }
  0x24   :  { %1190 = vst [vmem:[#allocation7_spill] sm:$0xff] %v891_v48  ;;  %v87_v49 = vmul.f32 %v889_v47, %v891_v48 }
  0x25   :  { %89 = vst [vmem:[#allocation1] ss:$2 sm:$0xff] %v62_v44 }
  0x28   :  { %140 = vperm.xlu1 %693, %v134_v13  }
  0x29   :  { %309 = vperm.xlu0 %692, %v680_v14   ;;  %172 = vperm.xlu2 %694, %v166_v15  }
  0x2c   :  { %v90_v50 = vld.sshfl [vmem:[#allocation1] sm:$0xff pattern:$0x75316420]  ;;  %v91_v51 = vld.sshfl [vmem:[#allocation1 + $0x8] sm:$0xff pattern:$0x75316420] }
  0x2d   :  { %95 = vst [vmem:[#allocation1] ss:$2 sm:$0xff] %v87_v49  ;;  %v901_v7 = vperm.slane %v90_v50, 1  ;;  %v903_v8 = vperm.slane %v91_v51, 1  ;;  %v909_v11 = vperm.slane %v90_v50, 0  ;;  %v911_v12 = vperm.slane %v91_v51, 0 }
  0x2e   :  { %v923_v24 = vperm.slane %v91_v51, 3  ;;  %v937_v36 = vperm.slane %v90_v50, 2 }
  0x30   :  { %304 = vperm.xlu1 %693, %v679_v16  }
  0x31   :  { %238 = vperm.xlu0 %692, %v674_v17   ;;  %370 = vperm.xlu2 %694, %v684_v18  }
  0x34   :  { %v96_v4 = vld.sshfl [vmem:[#allocation1] sm:$0xff pattern:$0x75316420]  ;;  %v97_v5 = vld.sshfl [vmem:[#allocation1 + $0x8] sm:$0xff pattern:$0x75316420] }
  0x35   :  { %v905_v9 = vperm.slane %v96_v4, 1  ;;  %v907_v10 = vperm.slane %v97_v5, 1  ;;  %v915_v15 = vperm.slane %v96_v4, 0  ;;  %v917_v16 = vperm.slane %v97_v5, 0 }
  0x36   :  { %v929_v28 = vperm.slane %v96_v4, 3  ;;  %v941_v40 = vperm.slane %v96_v4, 2  ;;  %v943_v43 = vperm.slane %v97_v5, 2 }
  0x38   :  { %299 = vperm.xlu1 %693, %v678_v21  }
  0x39   :  { %233 = vperm.xlu0 %692, %v673_v22   ;;  %365 = vperm.xlu2 %694, %v683_v23   ;;  %v921_v23 = vperm.slane %v90_v50, 3 }
  0x40   :  { %360 = vperm.xlu1 %693, %v682_v27  }
  0x41   :  { %294 = vperm.xlu0 %692, %v677_v29   ;;  %355 = vperm.xlu2 %694, %v681_v30   ;;  %v931_v29 = vperm.slane %v97_v5, 3 }
  0x49   :  { %557 = vperm.xlu0 %692, %v554_v37   ;;  %v939_v37 = vperm.slane %v91_v51, 2 }
  0x63   :  { %v112_v52 = vpop.permute.xlu2 %111 }
  0x64   :  { %v913_v13 = vmul.f32 %v124_v3, %v112_v52  ;;  %v919_v18 = vmul.f32 %v125_v6, %v112_v52 }
  0x6b   :  { %v895_v53 = vpop.permute.xlu2 %150 }
  0x73   :  { %v107_v54 = vpop.permute.xlu2 %106 }
  0x74   :  { %v925_v26 = vmul.f32 %v124_v3, %v107_v54  ;;  %v927_v27 = vmul.f32 %v125_v6, %v107_v54 }
  0x7a   :  { %v156_v56 = vpop.permute.xlu1 %155 }
  0x7b   :  { %v122_v57 = vpop.permute.xlu0 %121  ;;  %v244_v58 = vpop.permute.xlu2 %243 }
  0x7c   :  { %v132_v14 = vmul.f32 %v124_v3, %v122_v57  ;;  %v133_v20 = vmul.f32 %v125_v6, %v122_v57  ;;  %v263_v30 = vmul.f32 %v901_v7, %v244_v58  ;;  %v264_v31 = vmul.f32 %v903_v8, %v244_v58 }
  0x7d   :  { %v265_v32 = vmul.f32 %v905_v9, %v244_v58  ;;  %v266_v33 = vmul.f32 %v907_v10, %v244_v58 }
  0x7e   :  { %v164_v34 = vadd.f32 %v156_v56, %v132_v14  ;;  %v165_v38 = vadd.f32 %v156_v56, %v133_v20 }
  0x82   :  { %v188_v63 = vpop.permute.xlu1 %187 }
  0x83   :  { %v117_v1 = vpop.permute.xlu0 %116  ;;  %v899_v2 = vpop.permute.xlu2 %172  ;;  %v206_v44 = vmul.f32 %v909_v11, %v188_v63  ;;  %v207_v45 = vmul.f32 %v911_v12, %v188_v63  ;;  %v208_v52 = vmul.f32 %v915_v15, %v188_v63  ;;  %v209_v50 = vmul.f32 %v917_v16, %v188_v63 }
  0x84   :  { %v130_v35 = vmul.f32 %v124_v3, %v117_v1  ;;  %v131_v39 = vmul.f32 %v125_v6, %v117_v1  ;;  %v194_v54 = vmul.f32 %v909_v11, %v899_v2  ;;  %v195_v0 = vmul.f32 %v911_v12, %v899_v2 }
  0x85   :  { %v222_v1 = vadd.f32 %v206_v44, %v164_v34  ;;  %v223_v3 = vadd.f32 %v207_v45, %v164_v34  ;;  %v224_v14 = vadd.f32 %v208_v52, %v165_v38  ;;  %v225_v20 = vadd.f32 %v209_v50, %v165_v38 }
  0x86   :  { %v162_v55 = vadd.f32 %v895_v53, %v130_v35  ;;  %v163_v60 = vadd.f32 %v895_v53, %v131_v39 }
  0x8a   :  { %v249_v17 = vpop.permute.xlu1 %248 }
  0x8b   :  { %v183_v21 = vpop.permute.xlu0 %182  ;;  %v371_v22 = vpop.permute.xlu2 %370  ;;  %v267_v56 = vmul.f32 %v901_v7, %v249_v17  ;;  %v268_v57 = vmul.f32 %v903_v8, %v249_v17  ;;  %v269_v61 = vmul.f32 %v905_v9, %v249_v17  ;;  %v270_v62 = vmul.f32 %v907_v10, %v249_v17 }
  0x8c   :  { %v202_v46 = vmul.f32 %v909_v11, %v183_v21  ;;  %v203_v49 = vmul.f32 %v911_v12, %v183_v21  ;;  %v204_v51 = vmul.f32 %v915_v15, %v183_v21  ;;  %v205_v58 = vmul.f32 %v917_v16, %v183_v21 }
  0x8d   :  { %v196_v21 = vmul.f32 %v915_v15, %v899_v2  ;;  %v283_v53 = vadd.f32 %v267_v56, %v222_v1  ;;  %v284_v39 = vadd.f32 %v268_v57, %v223_v3  ;;  %v197_v17 = vmul.f32 %v917_v16, %v899_v2 }
  0x8e   :  { %v218_v4 = vadd.f32 %v202_v46, %v162_v55  ;;  %v219_v5 = vadd.f32 %v203_v49, %v162_v55  ;;  %v220_v35 = vadd.f32 %v204_v51, %v163_v60  ;;  %v221_v47 = vadd.f32 %v205_v58, %v163_v60 }
  0x8f   :  { %v285_v48 = vadd.f32 %v269_v61, %v224_v14  ;;  %v286_v41 = vadd.f32 %v270_v62, %v225_v20  ;;  %v389_v44 = vmul.f32 %v921_v23, %v371_v22  ;;  %v390_v34 = vmul.f32 %v923_v24, %v371_v22 }
  0x90   :  { %v391_v45 = vmul.f32 %v929_v28, %v371_v22  ;;  %v392_v38 = vmul.f32 %v931_v29, %v371_v22  ;;  %v279_v46 = vadd.f32 %v263_v30, %v218_v4  ;;  %v280_v49 = vadd.f32 %v264_v31, %v219_v5 }
  0x91   :  { %v281_v55 = vadd.f32 %v265_v32, %v220_v35  ;;  %v282_v60 = vadd.f32 %v266_v33, %v221_v47 }
  0x92   :  { %v178_v59 = vpop.permute.xlu1 %177 }
  0x93   :  { %v146_v63 = vpop.permute.xlu0 %145  ;;  %v366_v6 = vpop.permute.xlu2 %365  ;;  %v198_v50 = vmul.f32 %v909_v11, %v178_v59  ;;  %v199_v51 = vmul.f32 %v911_v12, %v178_v59  ;;  %v200_v56 = vmul.f32 %v915_v15, %v178_v59  ;;  %v201_v57 = vmul.f32 %v917_v16, %v178_v59 }
  0x94   :  { %v160_v52 = vadd.f32 %v146_v63, %v913_v13  ;;  %v161_v2 = vadd.f32 %v146_v63, %v919_v18  ;;  %v385_v61 = vmul.f32 %v921_v23, %v366_v6  ;;  %v386_v22 = vmul.f32 %v923_v24, %v366_v6 }
  0x95   :  { %v387_v30 = vmul.f32 %v929_v28, %v366_v6  ;;  %v388_v47 = vmul.f32 %v931_v29, %v366_v6 }
  0x96   :  { %v214_v16 = vadd.f32 %v198_v50, %v160_v52  ;;  %v215_v32 = vadd.f32 %v199_v51, %v160_v52  ;;  %v216_v3 = vadd.f32 %v200_v56, %v161_v2  ;;  %v217_v4 = vadd.f32 %v201_v57, %v161_v2 }
  0x9a   :  { %v141_v58 = vpop.permute.xlu1 %140 }
  0x9b   :  { %v158_v13 = vadd.f32 %v141_v58, %v925_v26  ;;  %v310_v11 = vpop.permute.xlu0 %309  ;;  %v159_v33 = vadd.f32 %v141_v58, %v927_v27  ;;  %v356_v26 = vpop.permute.xlu2 %355 }
  0x9c   :  { %v328_v12 = vmul.f32 %v937_v36, %v310_v11  ;;  %v329_v31 = vmul.f32 %v939_v37, %v310_v11  ;;  %v330_v18 = vmul.f32 %v941_v40, %v310_v11  ;;  %v331_v15 = vmul.f32 %v943_v43, %v310_v11 }
  0x9d   :  { %v210_v5 = vadd.f32 %v194_v54, %v158_v13  ;;  %v211_v14 = vadd.f32 %v195_v0, %v158_v13  ;;  %v212_v6 = vadd.f32 %v196_v21, %v159_v33  ;;  %v995_v50 = vadd.f32 %v197_v17, %v159_v33 }
  0x9e   :  { %v344_v59 = vadd.f32 %v328_v12, %v283_v53  ;;  %v345_v62 = vadd.f32 %v329_v31, %v284_v39  ;;  %v346_v63 = vadd.f32 %v330_v18, %v285_v48  ;;  %v347_v1 = vadd.f32 %v331_v15, %v286_v41 }
  0x9f   :  { %v998_v27 = vmul.f32 %v921_v23, %v356_v26  ;;  %v1001_v41 = vmul.f32 %v923_v24, %v356_v26  ;;  %v1020_v31 = vmul.f32 %v929_v28, %v356_v26  ;;  %v1023_v18 = vmul.f32 %v931_v29, %v356_v26 }
  0xa0   :  { %v987_v20 = vadd.f32 %v389_v44, %v344_v59  ;;  %v989_v35 = vadd.f32 %v390_v34, %v345_v62  ;;  %v991_v11 = vadd.f32 %v391_v45, %v346_v63  ;;  %v993_v52 = vadd.f32 %v392_v38, %v347_v1 }
  0xa2   :  { %v305_v48 = vpop.permute.xlu1 %304  ;;  %v421_v54 = vmul.f32 %v987_v20, %v987_v20  ;;  %v422_v0 = vmul.f32 %v989_v35, %v989_v35  ;;  %v423_v53 = vmul.f32 %v991_v11, %v991_v11  ;;  %v424_v21 = vmul.f32 %v993_v52, %v993_v52 }
  0xa3   :  { %v324_v39 = vmul.f32 %v937_v36, %v305_v48  ;;  %v325_v17 = vmul.f32 %v939_v37, %v305_v48  ;;  %v326_v44 = vmul.f32 %v941_v40, %v305_v48  ;;  %v327_v34 = vmul.f32 %v943_v43, %v305_v48  ;;  %v239_v45 = vpop.permute.xlu0 %238 }
  0xa4   :  { %v259_v38 = vmul.f32 %v901_v7, %v239_v45  ;;  %v260_v51 = vmul.f32 %v903_v8, %v239_v45  ;;  %v261_v2 = vmul.f32 %v905_v9, %v239_v45  ;;  %v262_v56 = vmul.f32 %v907_v10, %v239_v45 }
  0xa5   :  { %v340_v57 = vadd.f32 %v324_v39, %v279_v46  ;;  %v341_v58 = vadd.f32 %v325_v17, %v280_v49  ;;  %v342_v13 = vadd.f32 %v326_v44, %v281_v55  ;;  %v343_v12 = vadd.f32 %v327_v34, %v282_v60 }
  0xa6   :  { %v275_v15 = vadd.f32 %v259_v38, %v214_v16  ;;  %v276_v33 = vadd.f32 %v260_v51, %v215_v32  ;;  %v437_v59 = vmul.f32 %v421_v54, %v987_v20  ;;  %v438_v62 = vmul.f32 %v422_v0, %v989_v35 }
  0xa7   :  { %v439_v63 = vmul.f32 %v423_v53, %v991_v11  ;;  %v440_v1 = vmul.f32 %v424_v21, %v993_v52  ;;  %v277_v46 = vadd.f32 %v261_v2, %v216_v3  ;;  %v278_v49 = vadd.f32 %v262_v56, %v217_v4 }
  0xa8   :  { %v1029_v55 = vadd.f32 %v385_v61, %v340_v57  ;;  %v1031_v60 = vadd.f32 %v386_v22, %v341_v58  ;;  %v453_v48 = vmul.f32 0.044715, %v437_v59  ;;  %v454_v39 = vmul.f32 0.044715, %v438_v62 }
  0xa9   :  { %v1033_v26 = vadd.f32 %v387_v30, %v342_v13  ;;  %v1035_v16 = vadd.f32 %v388_v47, %v343_v12  ;;  %v455_v54 = vmul.f32 0.044715, %v439_v63  ;;  %v456_v17 = vmul.f32 0.044715, %v440_v1 }
  0xaa   :  { %v300_v32 = vpop.permute.xlu1 %299  ;;  %v417_v0 = vmul.f32 %v1029_v55, %v1029_v55  ;;  %v418_v3 = vmul.f32 %v1031_v60, %v1031_v60  ;;  %v469_v12 = vadd.f32 %v453_v48, %v987_v20 }
  0xab   :  { %v320_v61 = vmul.f32 %v937_v36, %v300_v32  ;;  %v321_v22 = vmul.f32 %v939_v37, %v300_v32  ;;  %v322_v4 = vmul.f32 %v941_v40, %v300_v32  ;;  %v323_v30 = vmul.f32 %v943_v43, %v300_v32  ;;  %v234_v53 = vpop.permute.xlu0 %233 }
  0xac   :  { %v255_v47 = vmul.f32 %v901_v7, %v234_v53  ;;  %v256_v21 = vmul.f32 %v903_v8, %v234_v53  ;;  %v257_v44 = vmul.f32 %v905_v9, %v234_v53  ;;  %v258_v34 = vmul.f32 %v907_v10, %v234_v53 }
  0xad   :  { %v336_v45 = vadd.f32 %v320_v61, %v275_v15  ;;  %v337_v38 = vadd.f32 %v321_v22, %v276_v33  ;;  %v338_v51 = vadd.f32 %v322_v4, %v277_v46  ;;  %v419_v2 = vmul.f32 %v1033_v26, %v1033_v26 }
  0xae   :  { %v271_v56 = vadd.f32 %v255_v47, %v210_v5  ;;  %v272_v57 = vadd.f32 %v256_v21, %v211_v14  ;;  %v273_v58 = vadd.f32 %v257_v44, %v212_v6  ;;  %v339_v13 = vadd.f32 %v323_v30, %v278_v49 }
  0xaf   :  { %v470_v7 = vadd.f32 %v454_v39, %v989_v35  ;;  %v471_v8 = vadd.f32 %v455_v54, %v991_v11  ;;  %v472_v9 = vadd.f32 %v456_v17, %v993_v52  ;;  %v274_v10 = vadd.f32 %v258_v34, %v995_v50 }
  0xb0   :  { %v433_v15 = vmul.f32 %v417_v0, %v1029_v55  ;;  %v434_v33 = vmul.f32 %v418_v3, %v1031_v60  ;;  %v420_v5 = vmul.f32 %v1035_v16, %v1035_v16  ;;  %v485_v14 = vmul.f32 0.7978846, %v469_v12 }
  0xb1   :  { %v486_v6 = vmul.f32 0.7978846, %v470_v7  ;;  %v487_v59 = vmul.f32 0.7978846, %v471_v8  ;;  %v435_v62 = vmul.f32 %v419_v2, %v1033_v26  ;;  %v488_v1 = vmul.f32 0.7978846, %v472_v9 }
  0xb2   :  { %v361_v63 = vpop.permute.xlu1 %360  ;;  %v449_v46 = vmul.f32 0.044715, %v433_v15  ;;  %v450_v49 = vmul.f32 0.044715, %v434_v33  ;;  %v436_v48 = vmul.f32 %v420_v5, %v1035_v16  ;;  %703 = vtanh.f32 %v485_v14 }
  0xb3   :  { %v381_v50 = vmul.f32 %v921_v23, %v361_v63  ;;  %v382_v39 = vmul.f32 %v923_v24, %v361_v63  ;;  %v383_v32 = vmul.f32 %v929_v28, %v361_v63  ;;  %v384_v54 = vmul.f32 %v931_v29, %v361_v63  ;;  %v295_v17 = vpop.permute.xlu0 %294 }
  0xb4   :  { %v316_v0 = vmul.f32 %v937_v36, %v295_v17  ;;  %v317_v3 = vmul.f32 %v939_v37, %v295_v17  ;;  %v318_v61 = vmul.f32 %v941_v40, %v295_v17  ;;  %v319_v22 = vmul.f32 %v943_v43, %v295_v17 }
  0xb5   :  { %v1070_v4 = vadd.f32 %v381_v50, %v336_v45  ;;  %v1072_v30 = vadd.f32 %v382_v39, %v337_v38  ;;  %v1074_v23 = vadd.f32 %v383_v32, %v338_v51  ;;  %v1076_v24 = vadd.f32 %v384_v54, %v339_v13 }
  0xb6   :  { %v332_v28 = vadd.f32 %v316_v0, %v271_v56  ;;  %v1078_v53 = vadd.f32 %v317_v3, %v272_v57  ;;  %v1080_v29 = vadd.f32 %v318_v61, %v273_v58  ;;  %v1082_v36 = vadd.f32 %v319_v22, %v274_v10 }
  0xb7   :  { %v465_v37 = vadd.f32 %v449_v46, %v1029_v55  ;;  %v466_v40 = vadd.f32 %v450_v49, %v1031_v60  ;;  %v451_v43 = vmul.f32 0.044715, %v435_v62  ;;  %705 = vtanh.f32 %v486_v6 }
  0xb8   :  { %v452_v47 = vmul.f32 0.044715, %v436_v48  ;;  %v413_v21 = vmul.f32 %v1070_v4, %v1070_v4  ;;  %v414_v44 = vmul.f32 %v1072_v30, %v1072_v30  ;;  %707 = vtanh.f32 %v487_v59  ;;  %v704_v9 = vpop.eup %703 }
  0xb9   :  { %v481_v34 = vmul.f32 0.7978846, %v465_v37  ;;  %v482_v45 = vmul.f32 0.7978846, %v466_v40  ;;  %v467_v38 = vadd.f32 %v451_v43, %v1033_v26  ;;  %709 = vtanh.f32 %v488_v1 }
  0xba   :  { %v468_v51 = vadd.f32 %v452_v47, %v1035_v16  ;;  %v429_v2 = vmul.f32 %v413_v21, %v1070_v4  ;;  %v430_v56 = vmul.f32 %v414_v44, %v1072_v30  ;;  %v415_v58 = vmul.f32 %v1074_v23, %v1074_v23 }
  0xbb   :  { %711 = vtanh.f32 %v481_v34  ;;  %v483_v57 = vmul.f32 0.7978846, %v467_v38  ;;  %v416_v13 = vmul.f32 %v1076_v24, %v1076_v24  ;;  %v1101_v33 = vadd.f32 %v998_v27, %v332_v28 }
  0xbc   :  { %713 = vtanh.f32 %v482_v45  ;;  %v484_v12 = vmul.f32 0.7978846, %v468_v51  ;;  %v445_v7 = vmul.f32 0.044715, %v429_v2  ;;  %v446_v8 = vmul.f32 0.044715, %v430_v56 }
  0xbd   :  { %715 = vtanh.f32 %v483_v57  ;;  %v431_v10 = vmul.f32 %v415_v58, %v1074_v23  ;;  %v432_v15 = vmul.f32 %v416_v13, %v1076_v24  ;;  %v706_v5 = vpop.eup %705  ;;  %v517_v14 = vadd.f32 1.0, %v704_v9 }
  0xbe   :  { %717 = vtanh.f32 %v484_v12  ;;  %v461_v6 = vadd.f32 %v445_v7, %v1070_v4  ;;  %v462_v59 = vadd.f32 %v446_v8, %v1072_v30  ;;  %v708_v62 = vpop.eup %707  ;;  %v518_v63 = vadd.f32 1.0, %v706_v5 }
  0xbf   :  { %v447_v1 = vmul.f32 0.044715, %v431_v10  ;;  %v448_v46 = vmul.f32 0.044715, %v432_v15  ;;  %v409_v49 = vmul.f32 %v1101_v33, %v1101_v33  ;;  %v710_v48 = vpop.eup %709  ;;  %v533_v50 = vmul.f32 0.5, %v517_v14 }
  0xc0   :  { %v519_v39 = vadd.f32 1.0, %v708_v62  ;;  %v477_v32 = vmul.f32 0.7978846, %v461_v6  ;;  %v478_v27 = vmul.f32 0.7978846, %v462_v59  ;;  %v534_v17 = vmul.f32 0.5, %v518_v63 }
  0xc1   :  { %v712_v54 = vpop.eup %711  ;;  %v520_v0 = vadd.f32 1.0, %v710_v48  ;;  %v463_v3 = vadd.f32 %v447_v1, %v1074_v23  ;;  %v464_v61 = vadd.f32 %v448_v46, %v1076_v24  ;;  %v549_v28 = vmul.f32 %v533_v50, %v987_v20 }
  0xc2   :  { %v714_v22 = vpop.eup %713  ;;  %v535_v37 = vmul.f32 0.5, %v519_v39  ;;  %v513_v40 = vadd.f32 1.0, %v712_v54  ;;  %719 = vtanh.f32 %v477_v32  ;;  %v550_v47 = vmul.f32 %v534_v17, %v989_v35 }
  0xc3   :  { %v716_v43 = vpop.eup %715  ;;  %v536_v21 = vmul.f32 0.5, %v520_v0  ;;  %v514_v44 = vadd.f32 1.0, %v714_v22  ;;  %721 = vtanh.f32 %v478_v27  ;;  %576 = vmatpush.msra.mxu0 %v549_v28  ;;  %v479_v2 = vmul.f32 0.7978846, %v463_v3 }
  0xc4   :  { %v718_v34 = vpop.eup %717  ;;  %v551_v45 = vmul.f32 %v535_v37, %v991_v11  ;;  %v529_v38 = vmul.f32 0.5, %v513_v40  ;;  %v515_v51 = vadd.f32 1.0, %v716_v43  ;;  %596 = vmatpush.msra.mxu1 %v550_v47  ;;  %v480_v58 = vmul.f32 0.7978846, %v464_v61 }
  0xc5   :  { %v552_v56 = vmul.f32 %v536_v21, %v993_v52  ;;  %v530_v20 = vmul.f32 0.5, %v514_v44  ;;  %v516_v57 = vadd.f32 1.0, %v718_v34  ;;  %723 = vtanh.f32 %v479_v2 }
  0xc6   :  { %616 = vmatpush.msra.mxu2 %v551_v45  ;;  %v545_v13 = vmul.f32 %v529_v38, %v1029_v55  ;;  %v531_v35 = vmul.f32 0.5, %v515_v51  ;;  %v425_v12 = vmul.f32 %v409_v49, %v1101_v33  ;;  %725 = vtanh.f32 %v480_v58 }
  0xc7   :  { %636 = vmatpush.msra.mxu3 %v552_v56  ;;  %v546_v7 = vmul.f32 %v530_v20, %v1031_v60  ;;  %v532_v11 = vmul.f32 0.5, %v516_v57  ;;  %v1118_v8 = vadd.f32 %v1001_v41, %v1078_v53  ;;  %v1123_v55 = vadd.f32 %v1020_v31, %v1080_v29 }
  0xc8   :  { %v720_v52 = vpop.eup %719  ;;  %577 = vmatpush.msra.mxu0 %v545_v13  ;;  %v547_v9 = vmul.f32 %v531_v35, %v1033_v26  ;;  %v441_v10 = vmul.f32 0.044715, %v425_v12  ;;  %v1127_v15 = vadd.f32 %v1023_v18, %v1082_v36  ;;  %v56_v13 = vmul.f32 0.57735026, %v848_v19 }
  0xc9   :  { %v722_v60 = vpop.eup %721  ;;  %597 = vmatpush.msra.mxu1 %v546_v7  ;;  %v548_v5 = vmul.f32 %v532_v11, %v1035_v16  ;;  %v509_v14 = vadd.f32 1.0, %v720_v52  ;;  %v410_v41 = vmul.f32 %v1118_v8, %v1118_v8  ;;  %v411_v31 = vmul.f32 %v1123_v55, %v1123_v55  ;;  %v558_v11 = vpop.permute.xlu0 %557 }
  0xca   :  { %617 = vmatpush.msra.mxu2 %v547_v9  ;;  %v510_v53 = vadd.f32 1.0, %v722_v60  ;;  %v457_v26 = vadd.f32 %v441_v10, %v1101_v33  ;;  %v412_v29 = vmul.f32 %v1127_v15, %v1127_v15  ;;  %v54_v35 = vmul.f32 0.33333334, %v882_v42  ;;  %v1191_v60 = vld [vmem:[#allocation5_spill] sm:$0xff] }
  0xcb   :  { %637 = vmatpush.msra.mxu3 %v548_v5  ;;  %v525_v18 = vmul.f32 0.5, %v509_v14  ;;  %v426_v36 = vmul.f32 %v410_v41, %v1118_v8  ;;  %v724_v6 = vpop.eup %723  ;;  %v427_v62 = vmul.f32 %v411_v31, %v1123_v55  ;;  %v57_v7 = vmul.f32 %v56_v13, %v882_v42  ;;  %v1192_v14 = vld [vmem:[#allocation7_spill] sm:$0xff] }
  0xcc   :  { %v526_v16 = vmul.f32 0.5, %v510_v53  ;;  %v473_v59 = vmul.f32 0.7978846, %v457_v26  ;;  %v428_v63 = vmul.f32 %v412_v29, %v1127_v15  ;;  %v726_v1 = vpop.eup %725  ;;  %v511_v49 = vadd.f32 1.0, %v724_v6 }
  0xcd   :  { %v541_v46 = vmul.f32 %v525_v18, %v1070_v4  ;;  %v442_v48 = vmul.f32 0.044715, %v426_v36  ;;  %v512_v39 = vadd.f32 1.0, %v726_v1  ;;  %v443_v32 = vmul.f32 0.044715, %v427_v62 }
  0xce   :  { %v542_v50 = vmul.f32 %v526_v16, %v1072_v30  ;;  %727 = vtanh.f32 %v473_v59  ;;  %v527_v27 = vmul.f32 0.5, %v511_v49  ;;  %v444_v17 = vmul.f32 0.044715, %v428_v63  ;;  %v1193_v59 = vld [vmem:[#allocation6_spill] sm:$0xff] }
  0xcf   :  { %578 = vmatpush.msra.mxu0 %v541_v46  ;;  %v458_v54 = vadd.f32 %v442_v48, %v1118_v8  ;;  %v528_v0 = vmul.f32 0.5, %v512_v39  ;;  %v459_v3 = vadd.f32 %v443_v32, %v1123_v55  ;;  %v78_v41 = vmul.f32 0.33333334, %v1192_v14 }
  0xd0   :  { %598 = vmatpush.msra.mxu1 %v542_v50  ;;  %v543_v61 = vmul.f32 %v527_v27, %v1074_v23  ;;  %v460_v4 = vadd.f32 %v444_v17, %v1127_v15  ;;  %v553_v23 = vld [vmem:[%s1181_s5] sm:$0xf] }
  0xd1   :  { %v474_v22 = vmul.f32 0.7978846, %v458_v54  ;;  %v544_v28 = vmul.f32 %v528_v0, %v1076_v24  ;;  %v475_v30 = vmul.f32 0.7978846, %v459_v3 }
  0xd2   :  { %618 = vmatpush.msra.mxu2 %v543_v61  ;;  %v476_v37 = vmul.f32 0.7978846, %v460_v4 }
  0xd3   :  { %729 = vtanh.f32 %v474_v22  ;;  %638 = vmatpush.msra.mxu3 %v544_v28 }
  0xd4   :  { %v728_v40 = vpop.eup %727  ;;  %731 = vtanh.f32 %v475_v30 }
  0xd5   :  { %v505_v43 = vadd.f32 1.0, %v728_v40  ;;  %733 = vtanh.f32 %v476_v37 }
  0xd7   :  { %v521_v47 = vmul.f32 0.5, %v505_v43 }
  0xd9   :  { %v730_v21 = vpop.eup %729  ;;  %v537_v44 = vmul.f32 %v521_v47, %v1101_v33 }
  0xda   :  { %v732_v34 = vpop.eup %731  ;;  %v506_v24 = vadd.f32 1.0, %v730_v21 }
  0xdb   :  { %v734_v45 = vpop.eup %733  ;;  %579 = vmatpush.msra.mxu0 %v537_v44  ;;  %v507_v38 = vadd.f32 1.0, %v732_v34 }
  0xdc   :  { %v522_v51 = vmul.f32 0.5, %v506_v24  ;;  %v508_v2 = vadd.f32 1.0, %v734_v45  ;;  %685 = vmatmul.msk.f32.vlgmr.msra.gmra.mxu0 %vm560_vm6, %v553_v23 }
  0xdd   :  { %v523_v56 = vmul.f32 0.5, %v507_v38 }
  0xde   :  { %v538_v20 = vmul.f32 %v522_v51, %v1118_v8  ;;  %v524_v57 = vmul.f32 0.5, %v508_v2  ;;  %v55_v8 = vmul.f32 %v54_v35, %v882_v42  ;;  %v79_v42 = vmul.f32 %v78_v41, %v1192_v14 }
  0xdf   :  { %v539_v33 = vmul.f32 %v523_v56, %v1123_v55 }
  0xe0   :  { %599 = vmatpush.msra.mxu1 %v538_v20  ;;  %v540_v58 = vmul.f32 %v524_v57, %v1127_v15  ;;  %v80_v15 = vmul.f32 0.57735026, %v861_v25  ;;  %v644_v5 = vmul.f32 %v1191_v60, %v55_v8  ;;  %v655_v62 = vmul.f32 %v1193_v59, %v79_v42 }
  0xe1   :  { %619 = vmatpush.msra.mxu2 %v539_v33  ;;  %686 = vmatmul.msk.f32.vlgmr.msra.gmra.mxu1 %vm560_vm6, %v553_v23 }
  0xe2   :  { %639 = vmatpush.msra.mxu3 %v540_v58  ;;  %687 = vmatmul.msk.f32.vlgmr.msra.gmra.mxu2 %vm560_vm6, %v553_v23  ;;  %v81_v31 = vmul.f32 %v80_v15, %v1192_v14 }
  0xe3   :  { %688 = vmatmul.msk.f32.vlgmr.msra.gmra.mxu3 %vm560_vm6, %v553_v23 }
 0x159   :  { %v581_v12 = vpop.f32.mrf.mxu0 }
 0x15a   :  { %v582_v9 = vadd.f32 %v581_v12, %v558_v11 }
 0x15c   :  { %v645_v19 = vmul.f32 %v582_v9, %v57_v7 }
 0x15e   :  { %v601_v52 = vpop.f32.mrf.mxu1 }
 0x15f   :  { %v602_v10 = vadd.f32 %v601_v52, %v558_v11 }
 0x161   :  { %v646_v55 = vmul.f32 %v602_v10, %v57_v7 }
 0x163   :  { %v649_v53 = vrot.slane %v646_v55, 4 }
 0x165   :  { %v651_v26 = vsel %vm650_vm7, %v645_v19, %v649_v53  ;;  %v621_v29 = vpop.f32.mrf.mxu2 }
 0x166   :  { %v653_v18 = vadd.f32 %v651_v26, %v644_v5  ;;  %v641_v36 = vpop.f32.mrf.mxu3  ;;  %v622_v6 = vadd.f32 %v621_v29, %v558_v11 }
 0x167   :  { %v642_v16 = vadd.f32 %v641_v36, %v558_v11 }
 0x168   :  { %654 = vst [vmem:[%s1183_s7] sm:$0xff] %v653_v18  ;;  %v656_v63 = vmul.f32 %v622_v6, %v81_v31 }
 0x169   :  { %v657_v25 = vmul.f32 %v642_v16, %v81_v31 }
 0x16b   :  { %v660_v1 = vrot.slane %v657_v25, 4 }
 0x16d   :  { %v661_v46 = vsel %vm650_vm7, %v656_v63, %v660_v1 }
 0x16e   :  { %v663_v49 = vadd.f32 %v661_v46, %v655_v62 }
 0x170   :  { %689 = vst [vmem:[%s1183_s7 + $0x8] sm:$0xff] %v663_v49 }
 0x171   :  { %670 = vsyncpa [#allocation3], 1 }

</bundles_post_ra>
